<compile_context>
chip_gen: v7x
topology: tpu7x:2x2x1
jax: 0.10.0
libtpu: 0.0.40
codegen_flags: <defaults>
</compile_context>

<pallas_src>
import jax
import jax.numpy as jnp
from jax.experimental import pallas as pl
from jax.experimental.pallas import tpu as pltpu


def _round_up(x, m):
    return (x + m - 1) // m * m


def _fcnn_kernel(x_ref, w1_ref, b1_ref, w2_ref, b2_ref,
                 w3_ref, b3_ref, w4_ref, b4_ref, o_ref):
    # fc1 + ReLU  (f32 accumulate, bf16 materialization of the activation)
    h = jnp.dot(x_ref[...].astype(jnp.bfloat16), w1_ref[...],
                preferred_element_type=jnp.float32)
    h = jnp.maximum(h + b1_ref[...], 0.0).astype(jnp.bfloat16)
    # fc2 + ReLU
    h = jnp.dot(h, w2_ref[...], preferred_element_type=jnp.float32)
    h = jnp.maximum(h + b2_ref[...], 0.0).astype(jnp.bfloat16)
    # fc3 + ReLU
    h = jnp.dot(h, w3_ref[...], preferred_element_type=jnp.float32)
    h = jnp.maximum(h + b3_ref[...], 0.0).astype(jnp.bfloat16)
    # fc4 (no activation in forward())
    h = jnp.dot(h, w4_ref[...], preferred_element_type=jnp.float32)
    o_ref[...] = (h + b4_ref[...]).astype(o_ref.dtype)


def init_params(key, input_dim, output_dim):
    """f32 master params matching torch nn.Linear default init, weights
    pre-transposed to (in, out)."""
    dims = [(input_dim, 512), (512, 256), (256, 128), (128, output_dim)]
    params = []
    for i, (din, dout) in enumerate(dims):
        kw, kb = jax.random.split(jax.random.fold_in(key, i))
        bound = 1.0 / (din ** 0.5)
        w = jax.random.uniform(kw, (din, dout), jnp.float32, -bound, bound)
        b = jax.random.uniform(kb, (dout,), jnp.float32, -bound, bound)
        params.append((w, b))
    return params


def prepare_params(params):
    """One-time conversion for the kernel: bf16 weights, f32 (1, N) biases.
    Done once outside the hot path (no per-call wrapper work)."""
    # TODO(synk): on v5e/v6e only, int8 weights with per-channel scales would
    # double MXU rate again; skipped (v7x MXU has no int path, accuracy TBD).
    return [(w.astype(jnp.bfloat16), b.reshape(1, -1).astype(jnp.float32))
            for (w, b) in params]


def _choose_tile(batch, tb_max=1024):
    """Batch tile: multiple of 8; >= 2 grid steps whenever batch allows (v7x
    megacore sharding); capped at tb_max; sized so the last (ragged) tile is
    nearly full (padding waste < 8 rows per step)."""
    if batch <= 8:
        return 8
    num_steps = max(2, pl.cdiv(batch, tb_max))
    tb = _round_up(pl.cdiv(batch, num_steps), 8)
    return min(tb, tb_max)


def fcnn_forward(x, kernel_params, *, tb_max=1024):
    """x: (1, batch, input_dim) f32. Mirrors FCNN.forward: squeeze(0), then
    fc1->ReLU->fc2->ReLU->fc3->ReLU->fc4. Returns (batch, output_dim) f32."""
    assert x.ndim == 3 and x.shape[0] == 1, (
        "FCNN.forward squeezes dim 0; expected x of shape (1, batch, input_dim)")
    (w1, b1), (w2, b2), (w3, b3), (w4, b4) = kernel_params
    _, batch, input_dim = x.shape
    assert w1.shape[0] == input_dim
    output_dim = w4.shape[1]

    tb = _choose_tile(batch, tb_max)
    grid = (pl.cdiv(batch, tb),)

    # x: leading unit dim squeezed in the BlockSpec; batch dim streamed;
    # contraction dim kept at its natural (unpadded) width.
    x_spec = pl.BlockSpec((None, tb, input_dim), lambda i: (0, i, 0))
    # Output at its logical width: no padded slab, no wrapper slice pass.
    out_spec = pl.BlockSpec((tb, output_dim), lambda i: (i, 0))

    def resident(arr):
        # Constant block index -> tensor stays VMEM-resident across the grid.
        # (pl.Buffered(1) would also drop the double buffer; ~0.4 MiB, skipped.)
        return pl.BlockSpec(arr.shape, lambda i: (0, 0))

    in_specs = [x_spec,
                resident(w1), resident(b1),
                resident(w2), resident(b2),
                resident(w3), resident(b3),
                resident(w4), resident(b4)]

    layer_dims = [(input_dim, 512), (512, 256), (256, 128), (128, output_dim)]
    flops = 2 * batch * sum(a * b for a, b in layer_dims)
    bytes_accessed = (x.size * x.dtype.itemsize
                      + batch * output_dim * 4
                      + sum(w.size * w.dtype.itemsize + b.size * b.dtype.itemsize
                            for w, b in kernel_params))

    return pl.pallas_call(
        _fcnn_kernel,
        out_shape=jax.ShapeDtypeStruct((batch, output_dim), jnp.float32),
        grid=grid,
        in_specs=in_specs,
        out_specs=out_spec,
        compiler_params=pltpu.CompilerParams(
            dimension_semantics=("parallel",),   # batch tiles shard across TCs (v7x)
            vmem_limit_bytes=32 * 1024 * 1024,   # honest budget; safe on v7x (64 MiB)
        ),
        cost_estimate=pl.CostEstimate(
            flops=flops, transcendentals=0, bytes_accessed=bytes_accessed),
    )(x, w1, b1, w2, b2, w3, b3, w4, b4)


if __name__ == "__main__":
    key = jax.random.PRNGKey(0)
    input_dim, output_dim = 32, 8

    params = init_params(key, input_dim, output_dim)       # f32 reference params
    kparams = prepare_params(params)                        # bf16 kernel params

    def reference(x2d):
        # Pure f32 reference mirroring the PyTorch module's forward().
        h = x2d
        for i, (w, b) in enumerate(params):
            h = h @ w + b
            if i < 3:
                h = jnp.maximum(h, 0.0)
        return h

    # Exercise both an even multi-step grid (batch=16 -> 2 tiles of 8) and a
    # ragged last tile (batch=13 -> tiles of 8, last one partially OOB-masked).
    for case, batch in enumerate((16, 13)):
        x = jax.random.normal(jax.random.fold_in(key, 100 + case),
                              (1, batch, input_dim), jnp.float32)
        out = fcnn_forward(x, kparams)
        jax.block_until_ready(out)
        ref = reference(x[0])
        assert out.shape == (batch, output_dim)
        max_err = float(jnp.max(jnp.abs(out - ref)))
        assert jnp.allclose(out, ref, atol=3e-2, rtol=3e-2), (
            f"batch={batch}: kernel diverged from f32 reference "
            f"(max abs err {max_err})")

    print("KERNEL_OK")
</pallas_src>

<mosaic_0001>
module attributes {stable_mosaic.version = 11 : i64} {
  func.func @_fcnn_kernel(%arg0: i32, %arg1: memref<1x8x32xf32, #tpu.memory_space<vmem>>, %arg2: memref<32x512xbf16, #tpu.memory_space<vmem>>, %arg3: memref<1x512xf32, #tpu.memory_space<vmem>>, %arg4: memref<512x256xbf16, #tpu.memory_space<vmem>>, %arg5: memref<1x256xf32, #tpu.memory_space<vmem>>, %arg6: memref<256x128xbf16, #tpu.memory_space<vmem>>, %arg7: memref<1x128xf32, #tpu.memory_space<vmem>>, %arg8: memref<128x8xbf16, #tpu.memory_space<vmem>>, %arg9: memref<1x8xf32, #tpu.memory_space<vmem>>, %arg10: memref<8x8xf32, #tpu.memory_space<vmem>>) attributes {dimension_semantics = [#tpu.dimension_semantics<parallel>], iteration_bounds = array<i64: 2>, scalar_prefetch = 0 : i64, scratch_operands = 0 : i64, tpu.core_type = #tpu.core_type<tc>, window_params = [{transform_indices = @transform_0, window_bounds = array<i64: 1, 8, 32>}, {pipeline_mode = #tpu.pipeline_mode<synchronous>, transform_indices = @transform_1, window_bounds = array<i64: 32, 512>}, {pipeline_mode = #tpu.pipeline_mode<synchronous>, transform_indices = @transform_2, window_bounds = array<i64: 1, 512>}, {pipeline_mode = #tpu.pipeline_mode<synchronous>, transform_indices = @transform_3, window_bounds = array<i64: 512, 256>}, {pipeline_mode = #tpu.pipeline_mode<synchronous>, transform_indices = @transform_4, window_bounds = array<i64: 1, 256>}, {pipeline_mode = #tpu.pipeline_mode<synchronous>, transform_indices = @transform_5, window_bounds = array<i64: 256, 128>}, {pipeline_mode = #tpu.pipeline_mode<synchronous>, transform_indices = @transform_6, window_bounds = array<i64: 1, 128>}, {pipeline_mode = #tpu.pipeline_mode<synchronous>, transform_indices = @transform_7, window_bounds = array<i64: 128, 8>}, {pipeline_mode = #tpu.pipeline_mode<synchronous>, transform_indices = @transform_8, window_bounds = array<i64: 1, 8>}, {transform_indices = @transform_9, window_bounds = array<i64: 8, 8>}]} {
    %c0 = arith.constant 0 : index
    %c0_0 = arith.constant 0 : index
    %c0_1 = arith.constant 0 : index
    %0 = vector.load %arg1[%c0, %c0_0, %c0_1] : memref<1x8x32xf32, #tpu.memory_space<vmem>>, vector<1x8x32xf32>
    %1 = vector.shape_cast %0 : vector<1x8x32xf32> to vector<8x32xf32>
    %2 = arith.truncf %1 : vector<8x32xf32> to vector<8x32xbf16>
    %c0_2 = arith.constant 0 : index
    %c0_3 = arith.constant 0 : index
    %3 = vector.load %arg2[%c0_2, %c0_3] : memref<32x512xbf16, #tpu.memory_space<vmem>>, vector<32x512xbf16>
    %cst = arith.constant dense<0.000000e+00> : vector<8x512xf32>
    %4 = tpu.matmul %2, %3, %cst {dimension_numbers = #tpu.dot_dimension_numbers<[1], [0], [0], [1], [0, 0, 1, 1], [], []>} : vector<8x32xbf16>, vector<32x512xbf16>, vector<8x512xf32> -> vector<8x512xf32>
    %c0_4 = arith.constant 0 : index
    %c0_5 = arith.constant 0 : index
    %5 = vector.load %arg3[%c0_4, %c0_5] : memref<1x512xf32, #tpu.memory_space<vmem>>, vector<1x512xf32>
    %6 = vector.broadcast %5 : vector<1x512xf32> to vector<8x512xf32>
    %7 = arith.addf %4, %6 : vector<8x512xf32>
    %cst_6 = arith.constant 0.000000e+00 : f32
    %8 = vector.broadcast %cst_6 : f32 to vector<8x512xf32>
    %9 = arith.maximumf %7, %8 : vector<8x512xf32>
    %10 = arith.truncf %9 : vector<8x512xf32> to vector<8x512xbf16>
    %c0_7 = arith.constant 0 : index
    %c0_8 = arith.constant 0 : index
    %11 = vector.load %arg4[%c0_7, %c0_8] : memref<512x256xbf16, #tpu.memory_space<vmem>>, vector<512x256xbf16>
    %cst_9 = arith.constant dense<0.000000e+00> : vector<8x256xf32>
    %12 = tpu.matmul %10, %11, %cst_9 {dimension_numbers = #tpu.dot_dimension_numbers<[1], [0], [0], [1], [0, 0, 1, 1], [], []>} : vector<8x512xbf16>, vector<512x256xbf16>, vector<8x256xf32> -> vector<8x256xf32>
    %c0_10 = arith.constant 0 : index
    %c0_11 = arith.constant 0 : index
    %13 = vector.load %arg5[%c0_10, %c0_11] : memref<1x256xf32, #tpu.memory_space<vmem>>, vector<1x256xf32>
    %14 = vector.broadcast %13 : vector<1x256xf32> to vector<8x256xf32>
    %15 = arith.addf %12, %14 : vector<8x256xf32>
    %cst_12 = arith.constant 0.000000e+00 : f32
    %16 = vector.broadcast %cst_12 : f32 to vector<8x256xf32>
    %17 = arith.maximumf %15, %16 : vector<8x256xf32>
    %18 = arith.truncf %17 : vector<8x256xf32> to vector<8x256xbf16>
    %c0_13 = arith.constant 0 : index
    %c0_14 = arith.constant 0 : index
    %19 = vector.load %arg6[%c0_13, %c0_14] : memref<256x128xbf16, #tpu.memory_space<vmem>>, vector<256x128xbf16>
    %cst_15 = arith.constant dense<0.000000e+00> : vector<8x128xf32>
    %20 = tpu.matmul %18, %19, %cst_15 {dimension_numbers = #tpu.dot_dimension_numbers<[1], [0], [0], [1], [0, 0, 1, 1], [], []>} : vector<8x256xbf16>, vector<256x128xbf16>, vector<8x128xf32> -> vector<8x128xf32>
    %c0_16 = arith.constant 0 : index
    %c0_17 = arith.constant 0 : index
    %21 = vector.load %arg7[%c0_16, %c0_17] : memref<1x128xf32, #tpu.memory_space<vmem>>, vector<1x128xf32>
    %22 = vector.broadcast %21 : vector<1x128xf32> to vector<8x128xf32>
    %23 = arith.addf %20, %22 : vector<8x128xf32>
    %cst_18 = arith.constant 0.000000e+00 : f32
    %24 = vector.broadcast %cst_18 : f32 to vector<8x128xf32>
    %25 = arith.maximumf %23, %24 : vector<8x128xf32>
    %26 = arith.truncf %25 : vector<8x128xf32> to vector<8x128xbf16>
    %c0_19 = arith.constant 0 : index
    %c0_20 = arith.constant 0 : index
    %27 = vector.load %arg8[%c0_19, %c0_20] : memref<128x8xbf16, #tpu.memory_space<vmem>>, vector<128x8xbf16>
    %cst_21 = arith.constant dense<0.000000e+00> : vector<8x8xf32>
    %28 = tpu.matmul %26, %27, %cst_21 {dimension_numbers = #tpu.dot_dimension_numbers<[1], [0], [0], [1], [0, 0, 1, 1], [], []>} : vector<8x128xbf16>, vector<128x8xbf16>, vector<8x8xf32> -> vector<8x8xf32>
    %c0_22 = arith.constant 0 : index
    %c0_23 = arith.constant 0 : index
    %29 = vector.load %arg9[%c0_22, %c0_23] : memref<1x8xf32, #tpu.memory_space<vmem>>, vector<1x8xf32>
    %30 = vector.broadcast %29 : vector<1x8xf32> to vector<8x8xf32>
    %31 = arith.addf %28, %30 : vector<8x8xf32>
    %c0_24 = arith.constant 0 : index
    %c0_25 = arith.constant 0 : index
    %32 = vector.load %arg10[%c0_24, %c0_25] : memref<8x8xf32, #tpu.memory_space<vmem>>, vector<8x8xf32>
    tpu.vector_store %arg10[%c0_24, %c0_25], %31 {strides = array<i32>} : memref<8x8xf32, #tpu.memory_space<vmem>>, vector<8x8xf32>,
    return
  }
  func.func @transform_0(%arg0: i32) -> (i32, i32, i32) {
    %c0_i32 = arith.constant 0 : i32
    %c0_i32_0 = arith.constant 0 : i32
    %c0_i32_1 = arith.constant 0 : i32
    return %c0_i32, %arg0, %c0_i32_0 : i32, i32, i32
  }
  func.func @transform_1(%arg0: i32) -> (i32, i32) {
    %c0_i32 = arith.constant 0 : i32
    %c0_i32_0 = arith.constant 0 : i32
    %c0_i32_1 = arith.constant 0 : i32
    return %c0_i32, %c0_i32_0 : i32, i32
  }
  func.func @transform_2(%arg0: i32) -> (i32, i32) {
    %c0_i32 = arith.constant 0 : i32
    %c0_i32_0 = arith.constant 0 : i32
    %c0_i32_1 = arith.constant 0 : i32
    return %c0_i32, %c0_i32_0 : i32, i32
  }
  func.func @transform_3(%arg0: i32) -> (i32, i32) {
    %c0_i32 = arith.constant 0 : i32
    %c0_i32_0 = arith.constant 0 : i32
    %c0_i32_1 = arith.constant 0 : i32
    return %c0_i32, %c0_i32_0 : i32, i32
  }
  func.func @transform_4(%arg0: i32) -> (i32, i32) {
    %c0_i32 = arith.constant 0 : i32
    %c0_i32_0 = arith.constant 0 : i32
    %c0_i32_1 = arith.constant 0 : i32
    return %c0_i32, %c0_i32_0 : i32, i32
  }
  func.func @transform_5(%arg0: i32) -> (i32, i32) {
    %c0_i32 = arith.constant 0 : i32
    %c0_i32_0 = arith.constant 0 : i32
    %c0_i32_1 = arith.constant 0 : i32
    return %c0_i32, %c0_i32_0 : i32, i32
  }
  func.func @transform_6(%arg0: i32) -> (i32, i32) {
    %c0_i32 = arith.constant 0 : i32
    %c0_i32_0 = arith.constant 0 : i32
    %c0_i32_1 = arith.constant 0 : i32
    return %c0_i32, %c0_i32_0 : i32, i32
  }
  func.func @transform_7(%arg0: i32) -> (i32, i32) {
    %c0_i32 = arith.constant 0 : i32
    %c0_i32_0 = arith.constant 0 : i32
    %c0_i32_1 = arith.constant 0 : i32
    return %c0_i32, %c0_i32_0 : i32, i32
  }
  func.func @transform_8(%arg0: i32) -> (i32, i32) {
    %c0_i32 = arith.constant 0 : i32
    %c0_i32_0 = arith.constant 0 : i32
    %c0_i32_1 = arith.constant 0 : i32
    return %c0_i32, %c0_i32_0 : i32, i32
  }
  func.func @transform_9(%arg0: i32) -> (i32, i32) {
    %c0_i32 = arith.constant 0 : i32
    %c0_i32_0 = arith.constant 0 : i32
    return %arg0, %c0_i32 : i32, i32
  }
}

</mosaic_0001>

<bundles_post_ra>
// kernel: tpu_custom_call.1
= control target key start
LH: loop header
LB: loop body
LE: loop exit
PB: predicated region body
PF: predicated region fallthrough
CT: control target
= control target key end

     0   :  { %14 = vsyncpa [#allocation3], 0  ;;  %s2213_s0 = inlined_call_operand.hbm [shape: f32[1,16,32], index: 0, kind: input, shape index: {}]   ;;  %s2214_s1 = inlined_call_operand.vmem [shape: bf16[32,512], index: 1, kind: input, shape index: {}]   ;;  %s2215_s2 = inlined_call_operand.vmem [shape: f32[1,512], index: 2, kind: input, shape index: {}]   ;;  %s2216_s3 = inlined_call_operand.hbm [shape: bf16[512,256], index: 3, kind: input, shape index: {}]   ;;  %s2217_s4 = inlined_call_operand.vmem [shape: f32[1,256], index: 4, kind: input, shape index: {}]   ;;  %s2218_s5 = inlined_call_operand.hbm [shape: bf16[256,128], index: 5, kind: input, shape index: {}]   ;;  %s2219_s6 = inlined_call_operand.vmem [shape: f32[1,128], index: 6, kind: input, shape index: {}]   ;;  %s2220_s7 = inlined_call_operand.vmem [shape: bf16[128,8], index: 7, kind: input, shape index: {}]   ;;  %s2221_s8 = inlined_call_operand.vmem [shape: f32[1,8], index: 8, kind: input, shape index: {}]   ;;  %s2222_s9 = inlined_call_operand.vmem [shape: f32[16,8], index: 9, kind: output, shape index: {}]  }
   0x1   :  { %16 = vsyncpa [#allocation3 + $0x1], 0 }
   0x2   :  { %17 = vsyncpa [#allocation5], 0  ;;  %s1956_s30 = smov 0   ;;  %s1958_s10 = smov 0  }
   0x3   :  { %s1960_s11 = smov 0   ;;  %s1962_s12 = smov 0  }
   0x4 LB: > { %s1975_s13 = sadd.s32 4294967295, %s1894_s12   ;;  %p43_p0 = scmp.ne.s32.totalorder %s1886_s10, %s1882_s30  ;;  %s1894_s12 = sphi %s1962_s12, %s2237_s12   ;;  %s1890_s11 = sphi %s1960_s11, %s2236_s11   ;;  %s1886_s10 = sphi %s1958_s10, %s2235_s10   ;;  %s1882_s30 = sphi %s1956_s30, %s2234_s30  }
   0x5   : > { %p2223_p1 = scmp.eq.s32.totalorder %s1975_s13, 0  ;;  %p1401_p2 = scmp.ge.s32.totalorder %s1894_s12, 1 }
   0x6   : > { %p248_p3 = scmp.lt.s32.totalorder %s1894_s12, 3  ;;  %s1896_s16 = smov [#allocation4]  }
   0x7   : > { %p1983_p4 = por %p2223_p1, %p43_p0  ;;  %s266_s17 = sshll.u32 %s1896_s16, 4  ;;  %s267_s17 = int_to_ptr.vmem [resolvable:$true] %s266_s17 }
   0x8   : > { %p1987_p5 = pnand %p1401_p2, %p248_p3  ;;  %s1897_s19 = smov [#allocation6]  }
   0x9   : > { %s2226_s14 = scalar_select %p1983_p4, 1, 0 }
   0xa   : > { %s2227_s15 = scalar_select %p1987_p5, 1, 0 }
   0xb   : > { %p1581_p6 = pneg %p1987_p5  ;;  %s282_s20 = sshll.u32 %s1897_s19, 4  ;;  %s1999_s20 = int_to_ptr.vmem [resolvable:$true] %s282_s20 }
   0xc   : > { %s1770_s23 = scalar_lea.hbm %s2216_s3, 8192 }
   0xd   : > { %p1995_p7 = pnand %p1581_p6, %p2223_p1  ;;  %p1771_p8 = scmp.ne.s32.totalorder %s2216_s3, %s1770_s23 }
   0xe   : > { %p1777_p12 = scmp.lt.u32.totalorder %s1770_s23, %s2216_s3 }
   0xf   : > { %p1772_p9 = pneg %p1995_p7 }
  0x11   : > { %p1773_p10 = pnand %p1772_p9, %p1771_p8 }
  0x13   : > { %p1774_p11 = pneg %p1773_p10 }
  0x15   : > { %p1779_p13 = pnand %p1777_p12, %p1774_p11 }
  0x17   : > { %1782 = shalt.err (!%p1779_p13)
}
  0x18   : > { %s1783_s28 = scalar_lea.vmem %s267_s17, 8192  ;;  %p1791_p6 = scmp.lt.s32.totalorder %s267_s17, %s267_s17 }
  0x19   : > { %p1784_p0 = scmp.ne.s32.totalorder %s267_s17, %s1783_s28  ;;  %p1792_p1 = scmp.lt.s32.totalorder %s1783_s28, %s1783_s28 }
  0x1b   : > { %p1786_p2 = pnand %p1784_p0, %p1772_p9  ;;  %p1793_p4 = por %p1792_p1, %p1791_p6 }
  0x1d   : > { %p1787_p3 = pneg %p1786_p2 }
  0x1f   : > { %p1794_p5 = pnand %p1793_p4, %p1787_p3 }
  0x21   : > { %1797 = shalt.err (!%p1794_p5)
}
  0x22   : > { %s1898_s29 = smov 128   ;;  %s1899_s30 = smov 8  }
  0x23   : > { %1584 = dma.hbm_to_vmem [thread:$0]  (!%p1995_p7), %s2216_s3, 8192, %s267_s17, [#allocation5], %s1898_s29, %s1898_s29, %s1899_s30  }
  0x24   : > { %s1798_s23 = scalar_lea.hbm %s2218_s5, 2048 }
  0x25   : > { %p1799_p8 = scmp.ne.s32.totalorder %s2218_s5, %s1798_s23  ;;  %p1805_p5 = scmp.lt.u32.totalorder %s1798_s23, %s2218_s5 }
  0x27   : > { %p1801_p1 = pnand %p1799_p8, %p1772_p9 }
  0x29   : > { %p1802_p4 = pneg %p1801_p1 }
  0x2b   : > { %p1807_p10 = pnand %p1805_p5, %p1802_p4 }
  0x2d   : > { %1810 = shalt.err (!%p1807_p10)
}
  0x2e   : > { %s1811_s17 = scalar_lea.vmem %s1999_s20, 2048  ;;  %p1819_p0 = scmp.lt.s32.totalorder %s1999_s20, %s1999_s20 }
  0x2f   : > { %p1812_p11 = scmp.ne.s32.totalorder %s1999_s20, %s1811_s17  ;;  %p1820_p2 = scmp.lt.s32.totalorder %s1811_s17, %s1811_s17 }
  0x31   : > { %p1814_p12 = pnand %p1812_p11, %p1772_p9  ;;  %p1821_p3 = por %p1820_p2, %p1819_p0 }
  0x33   : > { %p1815_p13 = pneg %p1814_p12 }
  0x35   : > { %p1822_p6 = pnand %p1821_p3, %p1815_p13 }
  0x37   : > { %1825 = shalt.err (!%p1822_p6)
}
  0x38   : > { %s1900_s28 = smov 64   ;;  %s1901_s29 = smov 4  }
  0x39   : > { %1587 = dma.hbm_to_vmem [thread:$0]  (!%p1995_p7), %s2218_s5, 2048, %s1999_s20, [#allocation5], %s1900_s28, %s1900_s28, %s1901_s29  }
  0x3a   : > { %s2049_s19 = sadd.s32 1, %s1894_s12   ;;  %s30_s22 = sadd.s32 1, %s1890_s11 }
  0x3b   : > { %s27_s21 = ssub.s32 %s1894_s12, %s2049_s19  ;;  %p37_p8 = scmp.ne.s32.totalorder %s1890_s11, %s1886_s10 }
  0x3c   : > { %p28_p9 = scmp.eq.s32.totalorder %s27_s21, 0  ;;  %p38_p1 = scmp.eq.s32.totalorder %s1894_s12, 0 }
  0x3d   : > { %p1594_p5 = scmp.lt.s32.totalorder %s1894_s12, 2  ;;  %s305_s24 = sand.u32 1, %s1890_s11  }
  0x3e   : > { %s2058_s23 = scalar_select %p28_p9, %s1890_s11, %s30_s22  }
  0x3f   : > { %p39_p4 = por %p38_p1, %p37_p8  ;;  %s1406_s25 = sshll.u32 %s1894_s12, 7 }
  0x40   : > { %s1405_s26 = sshll.u32 %s305_s24, 3  ;;  %s2066_s17 = scalar_lea.hbm %s2213_s0, %s1406_s25 }
  0x41   : > { %s309_s20 = scalar_lea.vmem [#allocation2], %s1405_s26  ;;  %p2068_p7 = pnand %p1594_p5, %p39_p4 }
  0x42   : > { %s316_s28 = sshll.u32 %s309_s20, 4  ;;  %s306_s12 = scalar_lea.sflag [#allocation3], %s305_s24  ;;  %s2072_s28 = int_to_ptr.vmem [resolvable:$true] %s316_s28 }
  0x43   : > { %s1826_s30 = scalar_lea.hbm %s2066_s17, 128  ;;  %p1828_p11 = pneg %p2068_p7 }
  0x44   : > { %p1827_p10 = scmp.ne.s32.totalorder %s2066_s17, %s1826_s30  ;;  %s1831_s22 = scalar_lea.hbm %s2213_s0, 256 }
  0x45   : > { %p1832_p0 = scmp.lt.u32.totalorder %s2066_s17, %s2213_s0  ;;  %p1833_p2 = scmp.lt.u32.totalorder %s1831_s22, %s1826_s30 }
  0x46   : > { %p1829_p12 = pnand %p1828_p11, %p1827_p10  ;;  %p1835_p6 = scmp.lt.u32.totalorder %s1826_s30, %s2066_s17 }
  0x47   : > { %p1834_p3 = por %p1833_p2, %p1832_p0 }
  0x48   : > { %p1830_p13 = pneg %p1829_p12 }
  0x49   : > { %p1836_p9 = por %p1835_p6, %p1834_p3 }
  0x4b   : > { %p1837_p8 = pnand %p1836_p9, %p1830_p13 }
  0x4d   : > { %1840 = shalt.err (!%p1837_p8)
}
  0x4e   : > { %s1841_s24 = scalar_lea.vmem %s2072_s28, 128  ;;  %s1902_s18 = smov [#allocation2]  }
  0x4f   : > { %p1842_p1 = scmp.ne.s32.totalorder %s2072_s28, %s1841_s24  ;;  %s1846_s27 = sshll.u32 %s1902_s18, 4  ;;  %s1847_s27 = int_to_ptr.vmem [resolvable:$false] %s1846_s27 }
  0x50   : > { %s1848_s20 = scalar_lea.vmem %s1847_s27, 256  ;;  %p1849_p10 = scmp.lt.s32.totalorder %s2072_s28, %s1847_s27 }
  0x51   : > { %p1844_p4 = pnand %p1842_p1, %p1828_p11  ;;  %p1850_p12 = scmp.lt.s32.totalorder %s1848_s20, %s1841_s24 }
  0x53   : > { %p1845_p5 = pneg %p1844_p4  ;;  %p1851_p0 = por %p1850_p12, %p1849_p10 }
  0x55   : > { %p1852_p2 = pnand %p1851_p0, %p1845_p5 }
  0x57   : > { %1855 = shalt.err (!%p1852_p2)
}
  0x58   : > { %1591 = dma.hbm_to_vmem [thread:$0]  (!%p2068_p7), %s2066_s17, 128, %s2072_s28, %s306_s12  }
  0x59   : > { %p2230_p13 = scmp.ne.s32.totalorder %s2227_s15, 0 }
  0x5a   : > { %s327_s30 = sand.u32 (!%p2230_p13), 1, %s1886_s10   ;;  %p2231_p11 = scmp.ne.s32.totalorder (!%p2230_p13), %s2226_s14, 0 }
  0x5b   : > { %325 = sbr.rel (%p2230_p13) target bundleno = 1051 (0x41b), region = 56  ;;  %s1408_s16 = sshll.u32 (!%p2230_p13), %s327_s30, 3 }
  0x5c   : > { %s328_s21 = scalar_lea.sflag (!%p2230_p13), [#allocation3], %s327_s30  ;;  %s331_s22 = scalar_lea.vmem (!%p2230_p13), [#allocation2], %s1408_s16 }
  0x62   : > { %1873 = dma.done.wait (%p2231_p11), %s328_s21, 128  }
  0x63   : > { %1875 = vsyncadd (%p2231_p11), %s328_s21, 4294967168  ;;  %p2232_p3 = scmp.eq.s32.totalorder %s1975_s13, 0 }
  0x65   : > { %1877 = dma.done.wait (%p2232_p3), [#allocation5], 10240   ;;  %p2233_p6 = pmov %p2232_p3 }
  0x66   : > { %v1903_v0 = vmov 0   ;;  %v1638_v1 = vld [vmem:[%s2214_s1 + $0x4] ss:$16 sps:$4 sm:$0xff]   ;;  %v1640_v2 = vld [vmem:[%s2214_s1] ss:$16 sps:$4 sm:$0xff]   ;;  %vm450_vm0 = vcmask 261120   ;;  %v390_v56 = vlaneseq }
  0x67   : > { %1879 = vsyncadd (%p2233_p6), [#allocation5], 4294957056  ;;  %486 = vmatprep.mubr.bf16.mxu1 %v1903_v0  ;;  %454 = vmatprep.subr.bf16.mxu1 %v1638_v1  ;;  %v1641_v3 = vld [vmem:[%s2214_s1 + $0x24] ss:$16 sps:$4 sm:$0xff]   ;;  %v1643_v4 = vld [vmem:[%s2214_s1 + $0x20] ss:$16 sps:$4 sm:$0xff]  }
  0x68   : > { %455 = vmatpush1.bf16.msra.mxu1 %v1640_v2  ;;  %v378_v5 = vld [vmem:[%s331_s22] sm:$0xff]  ;;  %v1650_v9 = vld [vmem:[#allocation4 + $0x4] ss:$8 sps:$4 sm:$0xff]   ;;  %v1652_v10 = vld [vmem:[#allocation4] ss:$8 sps:$4 sm:$0xff]   ;;  %v2136_v57 = vshrl.u32 %v390_v56, 7 }
  0x69   : > { %456 = vmatprep.subr.bf16.mxu1 %v1641_v3  ;;  %v1646_v6 = vld [vmem:[%s2214_s1 + $0xc] ss:$16 sps:$4 sm:$0xff]   ;;  %v1644_v7 = vld [vmem:[%s2214_s1 + $0x8] ss:$16 sps:$4 sm:$0xff]   ;;  %v379_v8 = vpack.c.bf16 %v378_v5, %v378_v5  ;;  %940 = vmatprep.subr.bf16.mxu0 %v1650_v9  ;;  %v1746_v44 = vld [vmem:[#allocation6 + $0x40] sm:$0xff]   ;;  %vm1905_vm1 = vmmov 0  }
  0x6a   : > { %v1653_v11 = vld [vmem:[#allocation4 + $0x14] ss:$8 sps:$4 sm:$0xff]   ;;  %941 = vmatpush1.bf16.msra.mxu0 %v1652_v10  ;;  %v1655_v13 = vld [vmem:[#allocation4 + $0x10] ss:$8 sps:$4 sm:$0xff]   ;;  %v1656_v14 = vld [vmem:[#allocation4 + $0x24] ss:$8 sps:$4 sm:$0xff]  }
  0x6b   : > { %v1649_v12 = vld [vmem:[%s2214_s1 + $0x2c] ss:$16 sps:$4 sm:$0xff]   ;;  %942 = vmatprep.subr.bf16.mxu0 %v1653_v11  ;;  %v1647_v15 = vld [vmem:[%s2214_s1 + $0x28] ss:$16 sps:$4 sm:$0xff]   ;;  %v1747_v45 = vld [vmem:[#allocation6] sm:$0xff]   ;;  %v392_v58 = vsub.s32 0, %v2136_v57 }
  0x6c   : > { %457 = vmatpush1.bf16.msra.mxu1 %v1643_v4  ;;  %v1658_v16 = vld [vmem:[#allocation4 + $0x20] ss:$8 sps:$4 sm:$0xff]   ;;  %v1659_v17 = vld [vmem:[#allocation4 + $0x34] ss:$8 sps:$4 sm:$0xff]   ;;  %v1661_v18 = vld [vmem:[#allocation4 + $0x30] ss:$8 sps:$4 sm:$0xff]  }
  0x6d   : > { %495 = vmatprep.subr.bf16.mxu1 %v1646_v6  ;;  %v1662_v19 = vld [vmem:[#allocation4 + $0x44] ss:$8 sps:$4 sm:$0xff]   ;;  %v1664_v20 = vld [vmem:[#allocation4 + $0x40] ss:$8 sps:$4 sm:$0xff]   ;;  %v1665_v21 = vld [vmem:[#allocation4 + $0x54] ss:$8 sps:$4 sm:$0xff]  }
  0x6e   : > { %943 = vmatpush1.bf16.msra.mxu0 %v1655_v13  ;;  %v1667_v22 = vld [vmem:[#allocation4 + $0x50] ss:$8 sps:$4 sm:$0xff]   ;;  %v1668_v23 = vld [vmem:[#allocation4 + $0x64] ss:$8 sps:$4 sm:$0xff]   ;;  %v1670_v24 = vld [vmem:[#allocation4 + $0x60] ss:$8 sps:$4 sm:$0xff]  }
  0x6f   : > { %1420 = vmatmul.mubr.msk.bf16.vlgmr.msra.gmra.mrb[0].mxu1 %vm450_vm0, %v379_v8  ;;  %944 = vmatprep.subr.bf16.mxu0 %v1656_v14  ;;  %v1671_v25 = vld [vmem:[#allocation4 + $0x74] ss:$8 sps:$4 sm:$0xff]   ;;  %v1673_v26 = vld [vmem:[#allocation4 + $0x70] ss:$8 sps:$4 sm:$0xff]   ;;  %v1674_v27 = vld [vmem:[#allocation4 + $0x84] ss:$8 sps:$4 sm:$0xff]  }
  0x70   : > { %496 = vmatpush1.bf16.msra.mxu1 %v1644_v7  ;;  %527 = vmatprep.mubr.bf16.mxu1 %v1903_v0  ;;  %v1676_v28 = vld [vmem:[#allocation4 + $0x80] ss:$8 sps:$4 sm:$0xff]   ;;  %v1677_v29 = vld [vmem:[#allocation4 + $0x94] ss:$8 sps:$4 sm:$0xff]   ;;  %v1679_v30 = vld [vmem:[#allocation4 + $0x90] ss:$8 sps:$4 sm:$0xff]  }
  0x71   : > { %497 = vmatprep.subr.bf16.mxu1 %v1649_v12  ;;  %v1680_v31 = vld [vmem:[#allocation4 + $0xa4] ss:$8 sps:$4 sm:$0xff]   ;;  %v1682_v32 = vld [vmem:[#allocation4 + $0xa0] ss:$8 sps:$4 sm:$0xff]   ;;  %v1683_v33 = vld [vmem:[#allocation4 + $0xb4] ss:$8 sps:$4 sm:$0xff]  }
  0x72   : > { %945 = vmatpush1.bf16.msra.mxu0 %v1658_v16  ;;  %v1685_v34 = vld [vmem:[#allocation4 + $0xb0] ss:$8 sps:$4 sm:$0xff]   ;;  %v1686_v35 = vld [vmem:[#allocation4 + $0xc4] ss:$8 sps:$4 sm:$0xff]   ;;  %v1688_v36 = vld [vmem:[#allocation4 + $0xc0] ss:$8 sps:$4 sm:$0xff]  }
  0x73   : > { %946 = vmatprep.subr.bf16.mxu0 %v1659_v17  ;;  %v1689_v37 = vld [vmem:[#allocation4 + $0xd4] ss:$8 sps:$4 sm:$0xff]   ;;  %v1691_v38 = vld [vmem:[#allocation4 + $0xd0] ss:$8 sps:$4 sm:$0xff]   ;;  %v1692_v39 = vld [vmem:[#allocation4 + $0xe4] ss:$8 sps:$4 sm:$0xff]  }
  0x74   : > { %498 = vmatpush1.bf16.msra.mxu1 %v1647_v15  ;;  %v1694_v40 = vld [vmem:[#allocation4 + $0xe0] ss:$8 sps:$4 sm:$0xff]   ;;  %v1695_v41 = vld [vmem:[#allocation4 + $0xf4] ss:$8 sps:$4 sm:$0xff]   ;;  %v1697_v42 = vld [vmem:[#allocation4 + $0xf0] ss:$8 sps:$4 sm:$0xff]  }
  0x75   : > { %v1700_v43 = vld [vmem:[#allocation4 + $0x104] ss:$8 sps:$4 sm:$0xff]   ;;  %1514 = vmatprep.subr.bf16.mxu1 %v1746_v44  ;;  %v1750_v48 = vld [vmem:[#allocation6 + $0x50] sm:$0xff]   ;;  %v1752_v50 = vld [vmem:[#allocation6 + $0x58] sm:$0xff]   ;;  %v396_v60 = vsub.s32 1, %v2136_v57  ;;  %v404_v4 = vsub.s32 3, %v2136_v57 }
  0x76   : > { %947 = vmatpush1.bf16.msra.mxu0 %v1661_v18  ;;  %v1748_v46 = vld [vmem:[#allocation6 + $0x48] sm:$0xff]   ;;  %v1751_v49 = vld [vmem:[#allocation6 + $0x10] sm:$0xff]   ;;  %v1753_v51 = vld [vmem:[#allocation6 + $0x18] sm:$0xff]   ;;  %p373_p7 = scmp.lt.s32.totalorder %s1975_s13, 1  ;;  %vm1314_vm2 = vcmask 64512  }
  0x77   : > { %1421 = vmatmul.mubr.msk.bf16.vlgmr.msra.gmra.mrb[4].mxu1 %vm450_vm0, %v379_v8  ;;  %948 = vmatprep.subr.bf16.mxu0 %v1662_v19  ;;  %v1749_v47 = vld [vmem:[#allocation6 + $0x8] sm:$0xff]   ;;  %v1754_v52 = vld [vmem:[#allocation6 + $0x60] sm:$0xff]   ;;  %v2142_v59 = vld [vmem:[%s2215_s2] sm:$0xf] }
  0x78   : > { %1515 = vmatpush3.bf16.msra.mxu1 %v1747_v45  ;;  %v1755_v53 = vld [vmem:[#allocation6 + $0x20] sm:$0xff]   ;;  %v1756_v54 = vld [vmem:[#allocation6 + $0x68] sm:$0xff]   ;;  %v393_v61 = vrot.slane %v2142_v59, %v392_v58  ;;  %v397_v62 = vrot.slane %v2142_v59, %v396_v60  ;;  %v405_v10 = vrot.slane %v2142_v59, %v404_v4  ;;  %v1703_v12 = vld [vmem:[#allocation4 + $0x114] ss:$8 sps:$4 sm:$0xff]   ;;  %s2239_s13 = smov (!%p373_p7, %s1975_s13), 1 }
  0x79   : > { %1516 = vmatprep.subr.bf16.mxu1 %v1748_v46  ;;  %v1757_v55 = vld [vmem:[#allocation6 + $0x28] sm:$0xff]   ;;  %v1701_v15 = vld [vmem:[#allocation4 + $0x110] ss:$8 sps:$4 sm:$0xff]   ;;  %v1739_v44 = vld [vmem:[#allocation4 + $0x1d4] ss:$8 sps:$4 sm:$0xff]   ;;  %s1411_s25 = sshll.u32 %s2239_s13, 3 }
  0x7a   : > { %949 = vmatpush1.bf16.msra.mxu0 %v1664_v20  ;;  %v1698_v9 = vld [vmem:[#allocation4 + $0x100] ss:$8 sps:$4 sm:$0xff]   ;;  %v1706_v18 = vld [vmem:[#allocation4 + $0x124] ss:$8 sps:$4 sm:$0xff]   ;;  %v1737_v45 = vld [vmem:[#allocation4 + $0x1d0] ss:$8 sps:$4 sm:$0xff]   ;;  %s376_s20 = scalar_lea.vmem %s2222_s9, %s1411_s25 }
  0x7b   : > { %950 = vmatprep.subr.bf16.mxu0 %v1665_v21  ;;  %v1704_v21 = vld [vmem:[#allocation4 + $0x120] ss:$8 sps:$4 sm:$0xff]   ;;  %v1760_v56 = vld [vmem:[#allocation6 + $0x78] sm:$0xff]  }
  0x7c   : > { %1517 = vmatpush3.bf16.msra.mxu1 %v1749_v47  ;;  %v1742_v47 = vld [vmem:[#allocation4 + $0x1e4] ss:$8 sps:$4 sm:$0xff]  }
  0x7d   : > { %1518 = vmatprep.subr.bf16.mxu1 %v1750_v48  ;;  %v1740_v48 = vld [vmem:[#allocation4 + $0x1e0] ss:$8 sps:$4 sm:$0xff]  }
  0x7e   : > { %951 = vmatpush1.bf16.msra.mxu0 %v1667_v22 }
  0x7f   : > { %952 = vmatprep.subr.bf16.mxu0 %v1668_v23  ;;  %v1709_v23 = vld [vmem:[#allocation4 + $0x134] ss:$8 sps:$4 sm:$0xff]  }
  0x80   : > { %1519 = vmatpush3.bf16.msra.mxu1 %v1751_v49 }
  0x81   : > { %1520 = vmatprep.subr.bf16.mxu1 %v1752_v50  ;;  %v1745_v50 = vld [vmem:[#allocation4 + $0x1f4] ss:$8 sps:$4 sm:$0xff]  }
  0x82   : > { %953 = vmatpush1.bf16.msra.mxu0 %v1670_v24  ;;  %v1707_v24 = vld [vmem:[#allocation4 + $0x130] ss:$8 sps:$4 sm:$0xff]  }
  0x83   : > { %954 = vmatprep.subr.bf16.mxu0 %v1671_v25  ;;  %v1712_v25 = vld [vmem:[#allocation4 + $0x144] ss:$8 sps:$4 sm:$0xff]  }
  0x84   : > { %1521 = vmatpush3.bf16.msra.mxu1 %v1753_v51  ;;  %v1743_v51 = vld [vmem:[#allocation4 + $0x1f0] ss:$8 sps:$4 sm:$0xff]  }
  0x85   : > { %1522 = vmatprep.subr.bf16.mxu1 %v1754_v52 }
  0x86   : > { %955 = vmatpush1.bf16.msra.mxu0 %v1673_v26  ;;  %v1710_v26 = vld [vmem:[#allocation4 + $0x140] ss:$8 sps:$4 sm:$0xff]  }
  0x87   : > { %956 = vmatprep.subr.bf16.mxu0 %v1674_v27  ;;  %v1715_v27 = vld [vmem:[#allocation4 + $0x154] ss:$8 sps:$4 sm:$0xff]  }
  0x88   : > { %1523 = vmatpush3.bf16.msra.mxu1 %v1755_v53 }
  0x89   : > { %1524 = vmatprep.subr.bf16.mxu1 %v1756_v54  ;;  %v1758_v54 = vld [vmem:[#allocation6 + $0x70] sm:$0xff]  }
  0x8a   : > { %957 = vmatpush1.bf16.msra.mxu0 %v1676_v28  ;;  %v1713_v28 = vld [vmem:[#allocation4 + $0x150] ss:$8 sps:$4 sm:$0xff]  }
  0x8b   : > { %958 = vmatprep.subr.bf16.mxu0 %v1677_v29  ;;  %v1718_v29 = vld [vmem:[#allocation4 + $0x164] ss:$8 sps:$4 sm:$0xff]  }
  0x8c   : > { %1525 = vmatpush3.bf16.msra.mxu1 %v1757_v55  ;;  %v1759_v55 = vld [vmem:[#allocation6 + $0x30] sm:$0xff]  }
  0x8d   : > { %1526 = vmatprep.subr.bf16.mxu1 %v1758_v54 }
  0x8e   : > { %959 = vmatpush1.bf16.msra.mxu0 %v1679_v30  ;;  %v1716_v30 = vld [vmem:[#allocation4 + $0x160] ss:$8 sps:$4 sm:$0xff]  }
  0x8f   : > { %960 = vmatprep.subr.bf16.mxu0 %v1680_v31  ;;  %v1721_v31 = vld [vmem:[#allocation4 + $0x174] ss:$8 sps:$4 sm:$0xff]  }
  0x90   : > { %1527 = vmatpush3.bf16.msra.mxu1 %v1759_v55 }
  0x91   : > { %1528 = vmatprep.subr.bf16.mxu1 %v1760_v56 }
  0x92   : > { %961 = vmatpush1.bf16.msra.mxu0 %v1682_v32  ;;  %v1719_v32 = vld [vmem:[#allocation4 + $0x170] ss:$8 sps:$4 sm:$0xff]  }
  0x93   : > { %962 = vmatprep.subr.bf16.mxu0 %v1683_v33  ;;  %v1724_v33 = vld [vmem:[#allocation4 + $0x184] ss:$8 sps:$4 sm:$0xff]  }
  0x96   : > { %963 = vmatpush1.bf16.msra.mxu0 %v1685_v34  ;;  %v1722_v34 = vld [vmem:[#allocation4 + $0x180] ss:$8 sps:$4 sm:$0xff]  }
  0x97   : > { %964 = vmatprep.subr.bf16.mxu0 %v1686_v35  ;;  %v1727_v35 = vld [vmem:[#allocation4 + $0x194] ss:$8 sps:$4 sm:$0xff]  }
  0x9a   : > { %965 = vmatpush1.bf16.msra.mxu0 %v1688_v36  ;;  %v1725_v36 = vld [vmem:[#allocation4 + $0x190] ss:$8 sps:$4 sm:$0xff]  }
  0x9b   : > { %966 = vmatprep.subr.bf16.mxu0 %v1689_v37  ;;  %v1730_v37 = vld [vmem:[#allocation4 + $0x1a4] ss:$8 sps:$4 sm:$0xff]  }
  0x9e   : > { %967 = vmatpush1.bf16.msra.mxu0 %v1691_v38  ;;  %v1728_v38 = vld [vmem:[#allocation4 + $0x1a0] ss:$8 sps:$4 sm:$0xff]  }
  0x9f   : > { %968 = vmatprep.subr.bf16.mxu0 %v1692_v39  ;;  %v1733_v39 = vld [vmem:[#allocation4 + $0x1b4] ss:$8 sps:$4 sm:$0xff]  }
  0xa2   : > { %969 = vmatpush1.bf16.msra.mxu0 %v1694_v40  ;;  %v1731_v40 = vld [vmem:[#allocation4 + $0x1b0] ss:$8 sps:$4 sm:$0xff]  }
  0xa3   : > { %970 = vmatprep.subr.bf16.mxu0 %v1695_v41  ;;  %v1736_v41 = vld [vmem:[#allocation4 + $0x1c4] ss:$8 sps:$4 sm:$0xff]  }
  0xa6   : > { %971 = vmatpush1.bf16.msra.mxu0 %v1697_v42  ;;  %v1734_v42 = vld [vmem:[#allocation4 + $0x1c0] ss:$8 sps:$4 sm:$0xff]  }
  0xa7   : > { %981 = vmatprep.subr.bf16.mxu0 %v1700_v43  ;;  %v400_v43 = vsub.s32 2, %v2136_v57  ;;  %v1763_v57 = vld [vmem:[%s2220_s7 + $0x8] sm:$0xff]  }
  0xa9   : > { %v401_v46 = vrot.slane %v2142_v59, %v400_v43  ;;  %v1761_v59 = vld [vmem:[#allocation6 + $0x38] sm:$0xff]  }
  0xaa   : > { %1529 = vmatpush3.bf16.msra.mxu1 %v1761_v59 }
 0x142   : > { %v488_v63 = vpop.f32.mrb[0].mxu1 }
 0x143   : > { %v489_v0 = vadd.f32 %v488_v63, %v393_v61  ;;  %v490_v1 = vpop.f32.mrb[1].mxu1  ;;  %v1904_v61 = vmov 0.0  }
 0x144   : > { %v491_v2 = vadd.f32 %v490_v1, %v397_v62  ;;  %v492_v3 = vpop.f32.mrb[2].mxu1  ;;  %1545 = vmatprep.subr.bf16.mxu1 %v1904_v61  ;;  %v608_v62 = vld [vmem:[%s2217_s4] sm:$0x3] }
 0x145   : > { %v536_v5 = vmax.f32 %v489_v0, 0.0  ;;  %v493_v6 = vpop.f32.mrb[3].mxu1  ;;  %v613_v63 = vrot.slane %v608_v62, %v392_v58  ;;  %v617_v0 = vrot.slane %v608_v62, %v396_v60  ;;  %v1764_v58 = vld [vmem:[%s2220_s7 + $0x10] sm:$0xff]   ;;  %v1765_v60 = vld [vmem:[%s2220_s7 + $0x18] sm:$0xff]  }
 0x146   : > { %v537_v7 = vmax.f32 %v491_v2, 0.0 }
 0x147   : > { %v540_v11 = vpack.c.bf16 %v536_v5, %v536_v5 }
 0x148   : > { %v541_v8 = vpack.c.bf16 %v537_v7, %v537_v7 }
 0x14a   : > { %972 = vmatprep.mubr.bf16.mxu0 %v541_v8  ;;  %v2153_v13 = vpop.f32.mrb[4].mxu1 }
 0x14b   : > { %973 = vmatmul.mubr.bf16.vlgmr.msra.gmra.mrb[0].mxu0 %v540_v11  ;;  %v531_v14 = vpop.f32.mrb[5].mxu1  ;;  %v530_v49 = vadd.f32 %v2153_v13, %v401_v46  ;;  %v1767_v13 = vld [vmem:[%s2220_s7 + $0x28] sm:$0xff]  }
 0x14c   : > { %982 = vmatpush1.bf16.msra.mxu0 %v1698_v9  ;;  %v532_v16 = vadd.f32 %v531_v14, %v405_v10  ;;  %v533_v17 = vpop.f32.mrb[6].mxu1  ;;  %v1762_v10 = vld [vmem:[%s2220_s7] sm:$0xff]   ;;  %v1768_v14 = vld [vmem:[%s2220_s7 + $0x30] sm:$0xff]  }
 0x14d   : > { %983 = vmatprep.subr.bf16.mxu0 %v1703_v12  ;;  %v534_v19 = vpop.f32.mrb[7].mxu1  ;;  %v538_v52 = vmax.f32 %v530_v49, 0.0  ;;  %v1766_v12 = vld [vmem:[%s2220_s7 + $0x20] sm:$0xff]  }
 0x14e   : > { %v539_v20 = vmax.f32 %v532_v16, 0.0  ;;  %v1486_v17 = vld [vmem:[%s2219_s6] ss:$0 sm:$0xff] }
 0x14f   : > { %v542_v53 = vpack.c.bf16 %v538_v52, %v538_v52 }
 0x150   : > { %984 = vmatpush1.bf16.msra.mxu0 %v1701_v15  ;;  %v543_v22 = vpack.c.bf16 %v539_v20, %v539_v20  ;;  %v1769_v15 = vld [vmem:[%s2220_s7 + $0x38] sm:$0xff]  }
 0x151   : > { %985 = vmatprep.subr.bf16.mxu0 %v1706_v18 }
 0x152   : > { %1013 = vmatprep.mubr.bf16.mxu0 %v543_v22 }
 0x154   : > { %986 = vmatpush1.bf16.msra.mxu0 %v1704_v21 }
 0x155   : > { %987 = vmatprep.subr.bf16.mxu0 %v1709_v23 }
 0x158   : > { %988 = vmatpush1.bf16.msra.mxu0 %v1707_v24 }
 0x159   : > { %989 = vmatprep.subr.bf16.mxu0 %v1712_v25  ;;  %v1503_v25 = vld [vmem:[%s2221_s8] ss:$0 sm:$0xff] }
 0x15c   : > { %990 = vmatpush1.bf16.msra.mxu0 %v1710_v26 }
 0x15d   : > { %991 = vmatprep.subr.bf16.mxu0 %v1715_v27 }
 0x160   : > { %992 = vmatpush1.bf16.msra.mxu0 %v1713_v28 }
 0x161   : > { %993 = vmatprep.subr.bf16.mxu0 %v1718_v29 }
 0x164   : > { %994 = vmatpush1.bf16.msra.mxu0 %v1716_v30 }
 0x165   : > { %995 = vmatprep.subr.bf16.mxu0 %v1721_v31 }
 0x168   : > { %996 = vmatpush1.bf16.msra.mxu0 %v1719_v32 }
 0x169   : > { %997 = vmatprep.subr.bf16.mxu0 %v1724_v33 }
 0x16c   : > { %998 = vmatpush1.bf16.msra.mxu0 %v1722_v34 }
 0x16d   : > { %999 = vmatprep.subr.bf16.mxu0 %v1727_v35 }
 0x170   : > { %1000 = vmatpush1.bf16.msra.mxu0 %v1725_v36 }
 0x171   : > { %1001 = vmatprep.subr.bf16.mxu0 %v1730_v37 }
 0x174   : > { %1002 = vmatpush1.bf16.msra.mxu0 %v1728_v38 }
 0x175   : > { %1003 = vmatprep.subr.bf16.mxu0 %v1733_v39 }
 0x178   : > { %1004 = vmatpush1.bf16.msra.mxu0 %v1731_v40 }
 0x179   : > { %1005 = vmatprep.subr.bf16.mxu0 %v1736_v41 }
 0x17c   : > { %1006 = vmatpush1.bf16.msra.mxu0 %v1734_v42 }
 0x17d   : > { %1007 = vmatprep.subr.bf16.mxu0 %v1739_v44 }
 0x180   : > { %1008 = vmatpush1.bf16.msra.mxu0 %v1737_v45 }
 0x181   : > { %1009 = vmatprep.subr.bf16.mxu0 %v1742_v47 }
 0x184   : > { %1010 = vmatpush1.bf16.msra.mxu0 %v1740_v48 }
 0x185   : > { %1011 = vmatprep.subr.bf16.mxu0 %v1745_v50 }
 0x188   : > { %1012 = vmatpush1.bf16.msra.mxu0 %v1743_v51 }
 0x18b   : > { %1014 = vmatmul.mubr.bf16.vlgmr.msra.gmra.mrb[0].mxu0 %v542_v53 }
 0x25e   : > { %v1015_v1 = vpop.f32.mrb[0].mxu0 }
 0x25f   : > { %v1565_v2 = vadd.f32 %v1015_v1, %v613_v63  ;;  %v1017_v3 = vpop.f32.mrb[1].mxu0 }
 0x260   : > { %v1566_v4 = vadd.f32 %v1017_v3, %v617_v0  ;;  %v1019_v5 = vpop.f32.mrb[2].mxu0 }
 0x261   : > { %v1022_v6 = vmax.f32 %v1565_v2, 0.0  ;;  %v1020_v7 = vpop.f32.mrb[3].mxu0 }
 0x262   : > { %v1023_v8 = vmax.f32 %v1566_v4, 0.0 }
 0x263   : > { %v1024_v11 = vpack.c.bf16 %v1022_v6, %v1022_v6 }
 0x264   : > { %v1025_v9 = vpack.c.bf16 %v1023_v8, %v1023_v8 }
 0x266   : > { %1193 = vmatprep.mubr.bf16.mxu1 %v1025_v9 }
 0x267   : > { %1194 = vmatmul.mubr.bf16.vlgmr.msra.gmra.mrb[8].mxu1 %v1024_v11 }
 0x268   : > { %1546 = vmatpush3.bf16.msra.mxu1 %v1762_v10  ;;  %1561 = vmatprep.mubr.msk.bf16.mxu1 %vm1905_vm1, %v1904_v61 }
 0x269   : > { %1547 = vmatprep.subr.bf16.mxu1 %v1904_v61 }
 0x26c   : > { %1548 = vmatpush3.bf16.msra.mxu1 %v1763_v57 }
 0x26d   : > { %1549 = vmatprep.subr.bf16.mxu1 %v1904_v61 }
 0x270   : > { %1550 = vmatpush3.bf16.msra.mxu1 %v1764_v58 }
 0x271   : > { %1551 = vmatprep.subr.bf16.mxu1 %v1904_v61 }
 0x274   : > { %1552 = vmatpush3.bf16.msra.mxu1 %v1765_v60 }
 0x275   : > { %1553 = vmatprep.subr.bf16.mxu1 %v1904_v61 }
 0x278   : > { %1554 = vmatpush3.bf16.msra.mxu1 %v1766_v12 }
 0x279   : > { %1555 = vmatprep.subr.bf16.mxu1 %v1904_v61 }
 0x27c   : > { %1556 = vmatpush3.bf16.msra.mxu1 %v1767_v13 }
 0x27d   : > { %1557 = vmatprep.subr.bf16.mxu1 %v1904_v61 }
 0x280   : > { %1558 = vmatpush3.bf16.msra.mxu1 %v1768_v14 }
 0x281   : > { %1559 = vmatprep.subr.bf16.mxu1 %v1904_v61 }
 0x284   : > { %1560 = vmatpush3.bf16.msra.mxu1 %v1769_v15 }
 0x33a   : > { %v1530_v16 = vpop.f32.mrb[8].mxu1 }
 0x33b   : > { %v1531_v18 = vpop.f32.mrb[9].mxu1 }
 0x33c   : > { %v1532_v19 = vadd.f32 %v1531_v18, %v1530_v16  ;;  %v1533_v20 = vpop.f32.mrb[10].mxu1 }
 0x33d   : > { %v1534_v21 = vpop.f32.mrb[11].mxu1 }
 0x33e   : > { %v1196_v22 = vadd.f32 %v1532_v19, %v1486_v17 }
 0x340   : > { %v1201_v23 = vmax.f32 %v1196_v22, 0.0 }
 0x342   : > { %v1202_v24 = vpack.c.bf16 %v1201_v23, %v1201_v23 }
 0x344   : > { %1562 = vmatmul.mubr.bf16.vlgmr.msra.gmra.mrb[12].mxu1 %v1202_v24 }
 0x417   : > { %v1308_v26 = vpop.f32.mrb[12].mxu1 }
 0x418   : > { %v1309_v27 = vadd.f32 %v1503_v25, %v1308_v26  ;;  %v1563_v28 = vpop.f32.mrb[13].mxu1 }
 0x419   : > { %v1311_v29 = vpop.f32.mrb[14].mxu1 }
 0x41a   : > { %1315 = vst.msk [vmem:[%s376_s20] sm:$0xff] %vm1314_vm2, %v1309_v27  ;;  %v1564_v30 = vpop.f32.mrb[15].mxu1 }
 0x41b PF: > { %p20_p9 = scmp.ge.s32.totalorder %s2049_s19, 4   ;;  %s2234_s30 = smov %s1886_s10 }
 0x41c   : > { %s2235_s10 = smov %s1890_s11  ;;  %s2236_s11 = smov %s2058_s23 }
 0x41d   : > { %s2237_s12 = smov %s2049_s19  ;;  %22 = sbr.rel (!%p20_p9) target bundleno = 4 (0x4), region = 104 }
 0x424   :  { %1335 = vsyncpa [#allocation3], 1 }
 0x425   :  { %1337 = vsyncpa [#allocation3 + $0x1], 1 }
 0x426   :  { %1338 = vsyncpa [#allocation5], 1 }

</bundles_post_ra>
